<compile_context>
chip_gen: v6e
topology: v6e:2x2x1
jax: 0.10.0
libtpu: 0.0.40
codegen_flags: <defaults>
</compile_context>

<pallas_src>
import functools

import jax
import jax.numpy as jnp
from jax.experimental import pallas as pl
from jax.experimental.pallas import tpu as pltpu


def _conv_tanh_kernel(*refs, H, W, ksize, pad, stride, cin_pad):
    """One grid step processes a block of B images.

    refs (stride=False): x_ref, w_ref, b_ref, mask_ref, o_ref, col_ref
    refs (stride=True) : x_ref, w_ref, b_ref, mask_ref, sel_ref, o_ref, col_ref

      x_ref   : (B, cin_pad, H*W)      inputs, spatial flattened on the lane axis
      w_ref   : (Cout, k*k*cin_pad)    weights, tap-major then cin (zero cols for the pad)
      b_ref   : (Cout, 1)              bias
      mask_ref: (k*k, H*W) f32         per-tap border masks (grid-invariant, resident)
      sel_ref : (H*W, Ho*Wo) f32       stride-2 lane-selection matrix (resident)
      o_ref   : (B, Cout, H*W)         stride=False output (lane-dense, NCHW-contiguous)
                (1, Cout, B*Ho*Wo)     stride=True lane-dense output slab
      col_ref : (k*k*cin_pad, H*W) f32 VMEM scratch: im2col patch matrix (reused per image)
    """
    if stride:
        x_ref, w_ref, b_ref, mask_ref, sel_ref, o_ref, col_ref = refs
    else:
        x_ref, w_ref, b_ref, mask_ref, o_ref, col_ref = refs
        sel_ref = None

    B = x_ref.shape[0]
    HW = H * W
    taps = ksize * ksize

    # Grid-invariant operands, loaded once per step.
    w = w_ref[...].astype(jnp.float32)                       # (Cout, K)
    bias = b_ref[...].astype(jnp.float32)                    # (Cout, 1)
    mask_all = mask_ref[...] > 0.5                           # (taps, HW) bool
    conds = [mask_all[t:t + 1, :] for t in range(taps)]      # each (1, HW)
    sel = sel_ref[...] if stride else None                   # (HW, Ho*Wo)

    strided_outs = []
    for b in range(B):                                        # static unroll, B is small
        xb = x_ref[b].astype(jnp.float32)                     # (cin_pad, HW)

        # Build im2col: col[tap*cin_pad + c, p] = xpad[c, h+kh-pad, w+kw-pad].
        # Each tap is an XLU lane rotation of the flattened image; positions whose
        # shifted source would fall outside the image (zero padding / roll wrap) are
        # selected to 0 via the precomputed border mask (jnp.where, not multiply).
        for kh in range(ksize):
            for kw in range(ksize):
                off = (kh - pad) * W + (kw - pad)             # lane shift of this tap
                tap = kh * ksize + kw
                rolled = xb if off == 0 else pltpu.roll(xb, shift=(-off) % HW, axis=1)
                col_ref[tap * cin_pad:(tap + 1) * cin_pad, :] = jnp.where(
                    conds[tap], rolled, 0.0)

        # One fused MXU matmul per image: (Cout, K) @ (K, HW) -> (Cout, HW)
        acc = jax.lax.dot_general(
            w, col_ref[...],
            dimension_numbers=(((1,), (0,)), ((), ())),
            preferred_element_type=jnp.float32)

        if stride:
            # In-kernel stride-2: keep lanes p = (2*ho)*W + 2*wo via an exact 0/1
            # selection matmul (stays on the MXU; selection matrix hoisted to wrapper).
            acc = jax.lax.dot_general(
                acc, sel,
                dimension_numbers=(((1,), (0,)), ((), ())),
                preferred_element_type=jnp.float32)           # (Cout, Ho*Wo)
            strided_outs.append(jnp.tanh(acc + bias))
        else:
            o_ref[b] = jnp.tanh(acc + bias).astype(o_ref.dtype)   # (Cout, HW) dense store

    if stride:
        # Lane-dense slab: concatenate the B images' strided outputs on the lane axis.
        y = strided_outs[0] if B == 1 else jnp.concatenate(strided_outs, axis=1)
        o_ref[0] = y.astype(o_ref.dtype)                       # (Cout, B*Ho*Wo)


def _choose_batch_per_step(N, max_b=8):
    """Images per grid step.

    Target grid length 2 so both v7x TensorCores get work (dimension_semantics parallel),
    batch as many images per step as possible otherwise, cap the static unroll, and make
    sure the result divides N.
    """
    target = N // 2 if (N >= 2 and N % 2 == 0) else N
    b = max(1, min(target, max_b))
    while N % b:
        b -= 1
    return b


def tanh_conv_block_pallas(x_nchw, weight, bias, *, padding=1, stride=False):
    """Forward of tanh_conv_block: Conv2d(in_c, out_c, k, padding[, stride=2]) + Tanh.

    x_nchw : (N, Cin, H, W)    float32 (PyTorch NCHW)
    weight : (Cout, Cin, k, k) float32 (PyTorch Conv2d layout)
    bias   : (Cout,)           float32
    returns: (N, Cout, Ho, Wo) float32 (NCHW)
    """
    N, Cin, H, W = x_nchw.shape
    Cout, _, k, _ = weight.shape
    # TODO(synk): only 'same'-style padding (2*padding == k-1) and stride in {1, 2} are
    # implemented — exactly what tanh_conv_block uses (size=3, padding=1, stride=2).
    assert 2 * padding == k - 1, "kernel assumes 'same'-style padding (2*padding == k-1)"

    s = 2 if stride else 1
    Ho = (H + 2 * padding - k) // s + 1
    Wo = (W + 2 * padding - k) // s + 1
    HW = H * W

    cin_pad = ((Cin + 7) // 8) * 8            # sublane-aligned tap blocks in the im2col
    K = k * k * cin_pad
    B = _choose_batch_per_step(N)
    grid_len = N // B

    # --- wrapper-side layout plumbing (tiny, one-time) ---------------------------------
    if cin_pad != Cin:
        x_use = jnp.pad(x_nchw, ((0, 0), (0, cin_pad - Cin), (0, 0), (0, 0)))
        w_use = jnp.pad(weight, ((0, 0), (0, cin_pad - Cin), (0, 0), (0, 0)))
    else:
        x_use, w_use = x_nchw, weight
    x_flat = x_use.reshape(N, cin_pad, HW)
    w_flat = jnp.transpose(w_use, (0, 2, 3, 1)).reshape(Cout, K)
    b2d = bias.reshape(Cout, 1)

    # Grid-invariant border masks for the k*k taps (hoisted out of the kernel body).
    hh = (jnp.arange(HW, dtype=jnp.int32) // W)[None, :]
    ww = (jnp.arange(HW, dtype=jnp.int32) % W)[None, :]
    rows = []
    for kh in range(k):
        for kw in range(k):
            dh, dw = kh - padding, kw - padding
            rows.append((hh >= -dh) & (hh < H - dh) & (ww >= -dw) & (ww < W - dw))
    masks = jnp.concatenate(rows, axis=0).astype(jnp.float32)       # (k*k, HW)

    kernel = functools.partial(_conv_tanh_kernel, H=H, W=W, ksize=k, pad=padding,
                               stride=bool(stride), cin_pad=cin_pad)

    common_in_specs = [
        pl.BlockSpec((B, cin_pad, HW), lambda nb: (nb, 0, 0)),
        pl.BlockSpec((Cout, K), lambda nb: (0, 0)),
        pl.BlockSpec((Cout, 1), lambda nb: (0, 0)),
        pl.BlockSpec((k * k, HW), lambda nb: (0, 0)),
    ]
    scratch = [pltpu.VMEM((K, HW), jnp.float32)]
    cparams = pltpu.CompilerParams(dimension_semantics=("parallel",))

    if not stride:
        out_flat = pl.pallas_call(
            kernel,
            out_shape=jax.ShapeDtypeStruct((N, Cout, HW), x_nchw.dtype),
            grid_spec=pltpu.PrefetchScalarGridSpec(
                num_scalar_prefetch=0,
                grid=(grid_len,),
                in_specs=common_in_specs,
                out_specs=pl.BlockSpec((B, Cout, HW), lambda nb: (nb, 0, 0)),
                scratch_shapes=scratch),
            compiler_params=cparams,
        )(x_flat, w_flat, b2d, masks)
        # Free reshape back to NCHW (data already contiguous in that order).
        return out_flat.reshape(N, Cout, Ho, Wo)

    # stride=2: hoisted 0/1 lane-selection matrix (HW -> Ho*Wo), resident in VMEM.
    q = jnp.arange(HW, dtype=jnp.int32)[:, None]
    t = jnp.arange(Ho * Wo, dtype=jnp.int32)[None, :]
    src = 2 * (t // Wo) * W + 2 * (t % Wo)
    sel = (q == src).astype(jnp.float32)                             # (HW, Ho*Wo)

    out_slab = pl.pallas_call(
        kernel,
        out_shape=jax.ShapeDtypeStruct((grid_len, Cout, B * Ho * Wo), x_nchw.dtype),
        grid_spec=pltpu.PrefetchScalarGridSpec(
            num_scalar_prefetch=0,
            grid=(grid_len,),
            in_specs=common_in_specs + [pl.BlockSpec((HW, Ho * Wo), lambda nb: (0, 0))],
            out_specs=pl.BlockSpec((1, Cout, B * Ho * Wo), lambda nb: (nb, 0, 0)),
            scratch_shapes=scratch),
        compiler_params=cparams,
    )(x_flat, w_flat, b2d, masks, sel)

    # Lane-dense slab -> NCHW: tiny wrapper-side layout fixup on the small strided output.
    out = out_slab.reshape(grid_len, Cout, B, Ho * Wo)
    out = jnp.transpose(out, (0, 2, 1, 3))
    return out.reshape(N, Cout, Ho, Wo)


def _reference(x_nchw, weight, bias, *, padding=1, stride=False):
    """Pure-JAX reference using lax.conv_general_dilated (mirrors PyTorch)."""
    s = 2 if stride else 1
    y = jax.lax.conv_general_dilated(
        x_nchw, weight,
        window_strides=(s, s),
        padding=((padding, padding), (padding, padding)),
        dimension_numbers=("NCHW", "OIHW", "NCHW"))
    return jnp.tanh(y + bias[None, :, None, None])


if __name__ == "__main__":
    key = jax.random.PRNGKey(0)
    k_x, k_w, k_b = jax.random.split(key, 3)

    # small shapes consistent with the module's forward
    N, Cin, H, W = 2, 4, 16, 16
    Cout, ksz = 8, 3

    x = jax.random.normal(k_x, (N, Cin, H, W), dtype=jnp.float32)

    # deterministic parameter init (PyTorch-default-like uniform scaling)
    fan_in = Cin * ksz * ksz
    bound = 1.0 / jnp.sqrt(jnp.float32(fan_in))
    weight = jax.random.uniform(k_w, (Cout, Cin, ksz, ksz),
                                minval=-bound, maxval=bound, dtype=jnp.float32)
    bias = jax.random.uniform(k_b, (Cout,),
                              minval=-bound, maxval=bound, dtype=jnp.float32)

    # default block (stride=False)
    out = tanh_conv_block_pallas(x, weight, bias, padding=1, stride=False)
    out = jax.block_until_ready(out)
    ref = _reference(x, weight, bias, padding=1, stride=False)
    assert out.shape == (N, Cout, H, W)
    assert jnp.allclose(out, ref, atol=1e-5, rtol=1e-5), "stride=1 mismatch vs reference"

    # strided block (Conv2d stride=2), handled fully in-kernel
    out_s = tanh_conv_block_pallas(x, weight, bias, padding=1, stride=True)
    out_s = jax.block_until_ready(out_s)
    ref_s = _reference(x, weight, bias, padding=1, stride=True)
    assert out_s.shape == (N, Cout, H // 2, W // 2)
    assert jnp.allclose(out_s, ref_s, atol=1e-5, rtol=1e-5), "stride=2 mismatch vs reference"

    print("KERNEL_OK")
</pallas_src>

<mosaic_0001>
module attributes {stable_mosaic.version = 11 : i64} {
  func.func @_conv_tanh_kernel(%arg0: i32, %arg1: memref<1x8x256xf32, #tpu.memory_space<vmem>>, %arg2: memref<8x72xf32, #tpu.memory_space<vmem>>, %arg3: memref<8x1xf32, #tpu.memory_space<vmem>>, %arg4: memref<9x256xf32, #tpu.memory_space<vmem>>, %arg5: memref<1x8x256xf32, #tpu.memory_space<vmem>>, %arg6: memref<72x256xf32, #tpu.memory_space<vmem>>) attributes {dimension_semantics = [#tpu.dimension_semantics<parallel>], iteration_bounds = array<i64: 2>, scalar_prefetch = 0 : i64, scratch_operands = 1 : i64, tpu.core_type = #tpu.core_type<tc>, window_params = [{transform_indices = @transform_0, window_bounds = array<i64: 1, 8, 256>}, {pipeline_mode = #tpu.pipeline_mode<synchronous>, transform_indices = @transform_1, window_bounds = array<i64: 8, 72>}, {pipeline_mode = #tpu.pipeline_mode<synchronous>, transform_indices = @transform_2, window_bounds = array<i64: 8, 1>}, {pipeline_mode = #tpu.pipeline_mode<synchronous>, transform_indices = @transform_3, window_bounds = array<i64: 9, 256>}, {transform_indices = @transform_4, window_bounds = array<i64: 1, 8, 256>}]} {
    %c0 = arith.constant 0 : index
    %c0_0 = arith.constant 0 : index
    %0 = vector.load %arg2[%c0, %c0_0] : memref<8x72xf32, #tpu.memory_space<vmem>>, vector<8x72xf32>
    %c0_1 = arith.constant 0 : index
    %c0_2 = arith.constant 0 : index
    %1 = vector.load %arg3[%c0_1, %c0_2] : memref<8x1xf32, #tpu.memory_space<vmem>>, vector<8x1xf32>
    %c0_3 = arith.constant 0 : index
    %c0_4 = arith.constant 0 : index
    %2 = vector.load %arg4[%c0_3, %c0_4] : memref<9x256xf32, #tpu.memory_space<vmem>>, vector<9x256xf32>
    %cst = arith.constant 5.000000e-01 : f32
    %3 = vector.broadcast %cst : f32 to vector<9x256xf32>
    %4 = arith.cmpf ogt, %2, %3 : vector<9x256xf32>
    %5 = vector.extract_strided_slice %4 {offsets = [0, 0], sizes = [1, 256], strides = [1, 1]} : vector<9x256xi1> to vector<1x256xi1>
    %6 = vector.extract_strided_slice %4 {offsets = [1, 0], sizes = [1, 256], strides = [1, 1]} : vector<9x256xi1> to vector<1x256xi1>
    %7 = vector.extract_strided_slice %4 {offsets = [2, 0], sizes = [1, 256], strides = [1, 1]} : vector<9x256xi1> to vector<1x256xi1>
    %8 = vector.extract_strided_slice %4 {offsets = [3, 0], sizes = [1, 256], strides = [1, 1]} : vector<9x256xi1> to vector<1x256xi1>
    %9 = vector.extract_strided_slice %4 {offsets = [4, 0], sizes = [1, 256], strides = [1, 1]} : vector<9x256xi1> to vector<1x256xi1>
    %10 = vector.extract_strided_slice %4 {offsets = [5, 0], sizes = [1, 256], strides = [1, 1]} : vector<9x256xi1> to vector<1x256xi1>
    %11 = vector.extract_strided_slice %4 {offsets = [6, 0], sizes = [1, 256], strides = [1, 1]} : vector<9x256xi1> to vector<1x256xi1>
    %12 = vector.extract_strided_slice %4 {offsets = [7, 0], sizes = [1, 256], strides = [1, 1]} : vector<9x256xi1> to vector<1x256xi1>
    %13 = vector.extract_strided_slice %4 {offsets = [8, 0], sizes = [1, 256], strides = [1, 1]} : vector<9x256xi1> to vector<1x256xi1>
    %c0_5 = arith.constant 0 : index
    %c0_6 = arith.constant 0 : index
    %c0_7 = arith.constant 0 : index
    %14 = vector.load %arg1[%c0_5, %c0_6, %c0_7] : memref<1x8x256xf32, #tpu.memory_space<vmem>>, vector<1x8x256xf32>
    %15 = vector.shape_cast %14 : vector<1x8x256xf32> to vector<8x256xf32>
    %c17_i32 = arith.constant 17 : i32
    %16 = tpu.dynamic_rotate %15 by %c17_i32 dim 1 : vector<8x256xf32>, i32 -> vector<8x256xf32>
    %cst_8 = arith.constant 0.000000e+00 : f32
    %17 = vector.shape_cast %5 : vector<1x256xi1> to vector<1x256xi1>
    %18 = vector.broadcast %17 : vector<1x256xi1> to vector<8x256xi1>
    %19 = vector.broadcast %cst_8 : f32 to vector<8x256xf32>
    %20 = arith.select %18, %16, %19 : vector<8x256xi1>, vector<8x256xf32>
    %c0_9 = arith.constant 0 : index
    %c0_10 = arith.constant 0 : index
    %21 = vector.load %arg6[%c0_9, %c0_10] : memref<72x256xf32, #tpu.memory_space<vmem>>, vector<8x256xf32>
    tpu.vector_store %arg6[%c0_9, %c0_10], %20 {strides = array<i32>} : memref<72x256xf32, #tpu.memory_space<vmem>>, vector<8x256xf32>,
    %c16_i32 = arith.constant 16 : i32
    %22 = tpu.dynamic_rotate %15 by %c16_i32 dim 1 : vector<8x256xf32>, i32 -> vector<8x256xf32>
    %cst_11 = arith.constant 0.000000e+00 : f32
    %23 = vector.shape_cast %6 : vector<1x256xi1> to vector<1x256xi1>
    %24 = vector.broadcast %23 : vector<1x256xi1> to vector<8x256xi1>
    %25 = vector.broadcast %cst_11 : f32 to vector<8x256xf32>
    %26 = arith.select %24, %22, %25 : vector<8x256xi1>, vector<8x256xf32>
    %c8 = arith.constant 8 : index
    %c0_12 = arith.constant 0 : index
    %27 = vector.load %arg6[%c8, %c0_12] : memref<72x256xf32, #tpu.memory_space<vmem>>, vector<8x256xf32>
    tpu.vector_store %arg6[%c8, %c0_12], %26 {strides = array<i32>} : memref<72x256xf32, #tpu.memory_space<vmem>>, vector<8x256xf32>,
    %c15_i32 = arith.constant 15 : i32
    %28 = tpu.dynamic_rotate %15 by %c15_i32 dim 1 : vector<8x256xf32>, i32 -> vector<8x256xf32>
    %cst_13 = arith.constant 0.000000e+00 : f32
    %29 = vector.shape_cast %7 : vector<1x256xi1> to vector<1x256xi1>
    %30 = vector.broadcast %29 : vector<1x256xi1> to vector<8x256xi1>
    %31 = vector.broadcast %cst_13 : f32 to vector<8x256xf32>
    %32 = arith.select %30, %28, %31 : vector<8x256xi1>, vector<8x256xf32>
    %c16 = arith.constant 16 : index
    %c0_14 = arith.constant 0 : index
    %33 = vector.load %arg6[%c16, %c0_14] : memref<72x256xf32, #tpu.memory_space<vmem>>, vector<8x256xf32>
    tpu.vector_store %arg6[%c16, %c0_14], %32 {strides = array<i32>} : memref<72x256xf32, #tpu.memory_space<vmem>>, vector<8x256xf32>,
    %c1_i32 = arith.constant 1 : i32
    %34 = tpu.dynamic_rotate %15 by %c1_i32 dim 1 : vector<8x256xf32>, i32 -> vector<8x256xf32>
    %cst_15 = arith.constant 0.000000e+00 : f32
    %35 = vector.shape_cast %8 : vector<1x256xi1> to vector<1x256xi1>
    %36 = vector.broadcast %35 : vector<1x256xi1> to vector<8x256xi1>
    %37 = vector.broadcast %cst_15 : f32 to vector<8x256xf32>
    %38 = arith.select %36, %34, %37 : vector<8x256xi1>, vector<8x256xf32>
    %c24 = arith.constant 24 : index
    %c0_16 = arith.constant 0 : index
    %39 = vector.load %arg6[%c24, %c0_16] : memref<72x256xf32, #tpu.memory_space<vmem>>, vector<8x256xf32>
    tpu.vector_store %arg6[%c24, %c0_16], %38 {strides = array<i32>} : memref<72x256xf32, #tpu.memory_space<vmem>>, vector<8x256xf32>,
    %cst_17 = arith.constant 0.000000e+00 : f32
    %40 = vector.shape_cast %9 : vector<1x256xi1> to vector<1x256xi1>
    %41 = vector.broadcast %40 : vector<1x256xi1> to vector<8x256xi1>
    %42 = vector.broadcast %cst_17 : f32 to vector<8x256xf32>
    %43 = arith.select %41, %15, %42 : vector<8x256xi1>, vector<8x256xf32>
    %c32 = arith.constant 32 : index
    %c0_18 = arith.constant 0 : index
    %44 = vector.load %arg6[%c32, %c0_18] : memref<72x256xf32, #tpu.memory_space<vmem>>, vector<8x256xf32>
    tpu.vector_store %arg6[%c32, %c0_18], %43 {strides = array<i32>} : memref<72x256xf32, #tpu.memory_space<vmem>>, vector<8x256xf32>,
    %c255_i32 = arith.constant 255 : i32
    %45 = tpu.dynamic_rotate %15 by %c255_i32 dim 1 : vector<8x256xf32>, i32 -> vector<8x256xf32>
    %cst_19 = arith.constant 0.000000e+00 : f32
    %46 = vector.shape_cast %10 : vector<1x256xi1> to vector<1x256xi1>
    %47 = vector.broadcast %46 : vector<1x256xi1> to vector<8x256xi1>
    %48 = vector.broadcast %cst_19 : f32 to vector<8x256xf32>
    %49 = arith.select %47, %45, %48 : vector<8x256xi1>, vector<8x256xf32>
    %c40 = arith.constant 40 : index
    %c0_20 = arith.constant 0 : index
    %50 = vector.load %arg6[%c40, %c0_20] : memref<72x256xf32, #tpu.memory_space<vmem>>, vector<8x256xf32>
    tpu.vector_store %arg6[%c40, %c0_20], %49 {strides = array<i32>} : memref<72x256xf32, #tpu.memory_space<vmem>>, vector<8x256xf32>,
    %c241_i32 = arith.constant 241 : i32
    %51 = tpu.dynamic_rotate %15 by %c241_i32 dim 1 : vector<8x256xf32>, i32 -> vector<8x256xf32>
    %cst_21 = arith.constant 0.000000e+00 : f32
    %52 = vector.shape_cast %11 : vector<1x256xi1> to vector<1x256xi1>
    %53 = vector.broadcast %52 : vector<1x256xi1> to vector<8x256xi1>
    %54 = vector.broadcast %cst_21 : f32 to vector<8x256xf32>
    %55 = arith.select %53, %51, %54 : vector<8x256xi1>, vector<8x256xf32>
    %c48 = arith.constant 48 : index
    %c0_22 = arith.constant 0 : index
    %56 = vector.load %arg6[%c48, %c0_22] : memref<72x256xf32, #tpu.memory_space<vmem>>, vector<8x256xf32>
    tpu.vector_store %arg6[%c48, %c0_22], %55 {strides = array<i32>} : memref<72x256xf32, #tpu.memory_space<vmem>>, vector<8x256xf32>,
    %c240_i32 = arith.constant 240 : i32
    %57 = tpu.dynamic_rotate %15 by %c240_i32 dim 1 : vector<8x256xf32>, i32 -> vector<8x256xf32>
    %cst_23 = arith.constant 0.000000e+00 : f32
    %58 = vector.shape_cast %12 : vector<1x256xi1> to vector<1x256xi1>
    %59 = vector.broadcast %58 : vector<1x256xi1> to vector<8x256xi1>
    %60 = vector.broadcast %cst_23 : f32 to vector<8x256xf32>
    %61 = arith.select %59, %57, %60 : vector<8x256xi1>, vector<8x256xf32>
    %c56 = arith.constant 56 : index
    %c0_24 = arith.constant 0 : index
    %62 = vector.load %arg6[%c56, %c0_24] : memref<72x256xf32, #tpu.memory_space<vmem>>, vector<8x256xf32>
    tpu.vector_store %arg6[%c56, %c0_24], %61 {strides = array<i32>} : memref<72x256xf32, #tpu.memory_space<vmem>>, vector<8x256xf32>,
    %c239_i32 = arith.constant 239 : i32
    %63 = tpu.dynamic_rotate %15 by %c239_i32 dim 1 : vector<8x256xf32>, i32 -> vector<8x256xf32>
    %cst_25 = arith.constant 0.000000e+00 : f32
    %64 = vector.shape_cast %13 : vector<1x256xi1> to vector<1x256xi1>
    %65 = vector.broadcast %64 : vector<1x256xi1> to vector<8x256xi1>
    %66 = vector.broadcast %cst_25 : f32 to vector<8x256xf32>
    %67 = arith.select %65, %63, %66 : vector<8x256xi1>, vector<8x256xf32>
    %c64 = arith.constant 64 : index
    %c0_26 = arith.constant 0 : index
    %68 = vector.load %arg6[%c64, %c0_26] : memref<72x256xf32, #tpu.memory_space<vmem>>, vector<8x256xf32>
    tpu.vector_store %arg6[%c64, %c0_26], %67 {strides = array<i32>} : memref<72x256xf32, #tpu.memory_space<vmem>>, vector<8x256xf32>,
    %c0_27 = arith.constant 0 : index
    %c0_28 = arith.constant 0 : index
    %69 = vector.load %arg6[%c0_27, %c0_28] : memref<72x256xf32, #tpu.memory_space<vmem>>, vector<72x256xf32>
    %cst_29 = arith.constant dense<0.000000e+00> : vector<8x256xf32>
    %70 = tpu.matmul %0, %69, %cst_29 {dimension_numbers = #tpu.dot_dimension_numbers<[1], [0], [0], [1], [0, 0, 1, 1], [], []>} : vector<8x72xf32>, vector<72x256xf32>, vector<8x256xf32> -> vector<8x256xf32>
    %71 = vector.broadcast %1 : vector<8x1xf32> to vector<8x256xf32>
    %72 = arith.addf %70, %71 : vector<8x256xf32>
    %73 = math.tanh %72 : vector<8x256xf32>
    %c0_30 = arith.constant 0 : index
    %c0_31 = arith.constant 0 : index
    %c0_32 = arith.constant 0 : index
    %74 = vector.load %arg5[%c0_30, %c0_31, %c0_32] : memref<1x8x256xf32, #tpu.memory_space<vmem>>, vector<1x8x256xf32>
    %75 = vector.shape_cast %74 : vector<1x8x256xf32> to vector<8x256xf32>
    %76 = vector.shape_cast %73 : vector<8x256xf32> to vector<1x8x256xf32>
    tpu.vector_store %arg5[%c0_30, %c0_31, %c0_32], %76 {strides = array<i32>} : memref<1x8x256xf32, #tpu.memory_space<vmem>>, vector<1x8x256xf32>,
    return
  }
  func.func @transform_0(%arg0: i32) -> (i32, i32, i32) {
    %c0_i32 = arith.constant 0 : i32
    %c0_i32_0 = arith.constant 0 : i32
    %c0_i32_1 = arith.constant 0 : i32
    return %arg0, %c0_i32, %c0_i32_0 : i32, i32, i32
  }
  func.func @transform_1(%arg0: i32) -> (i32, i32) {
    %c0_i32 = arith.constant 0 : i32
    %c0_i32_0 = arith.constant 0 : i32
    %c0_i32_1 = arith.constant 0 : i32
    return %c0_i32, %c0_i32_0 : i32, i32
  }
  func.func @transform_2(%arg0: i32) -> (i32, i32) {
    %c0_i32 = arith.constant 0 : i32
    %c0_i32_0 = arith.constant 0 : i32
    %c0_i32_1 = arith.constant 0 : i32
    return %c0_i32, %c0_i32_0 : i32, i32
  }
  func.func @transform_3(%arg0: i32) -> (i32, i32) {
    %c0_i32 = arith.constant 0 : i32
    %c0_i32_0 = arith.constant 0 : i32
    %c0_i32_1 = arith.constant 0 : i32
    return %c0_i32, %c0_i32_0 : i32, i32
  }
  func.func @transform_4(%arg0: i32) -> (i32, i32, i32) {
    %c0_i32 = arith.constant 0 : i32
    %c0_i32_0 = arith.constant 0 : i32
    %c0_i32_1 = arith.constant 0 : i32
    return %arg0, %c0_i32, %c0_i32_0 : i32, i32, i32
  }
}

</mosaic_0001>

<bundles_post_ra>
// kernel: tpu_custom_call.1
= control target key start
LH: loop header
LB: loop body
LE: loop exit
PB: predicated region body
PF: predicated region fallthrough
CT: control target
= control target key end

     0   :  { %9 = vsyncpa [#allocation4], 0  ;;  %s2576_s0 = inlined_call_operand.hbm [shape: f32[2,8,256], index: 0, kind: input, shape index: {}]   ;;  %s2577_s1 = inlined_call_operand.vmem [shape: f32[8,72], index: 1, kind: input, shape index: {}]   ;;  %s2578_s2 = inlined_call_operand.vmem [shape: f32[8,1], index: 2, kind: input, shape index: {}]   ;;  %s2579_s3 = inlined_call_operand.hbm [shape: f32[9,256], index: 3, kind: input, shape index: {}]   ;;  %s2580_s4 = inlined_call_operand.hbm [shape: f32[2,8,256], index: 4, kind: output, shape index: {}]  }
   0x1   :  { %11 = vsyncpa [#allocation4 + $0x1], 0 }
   0x2   :  { %12 = vsyncpa [#allocation7], 0 }
   0x3   :  { %13 = vsyncpa [#allocation5], 0 }
   0x4   :  { %15 = vsyncpa [#allocation5 + $0x1], 0  ;;  %s1632_s15 = smov 0   ;;  %s1634_s16 = smov 0  }
   0x5   :  { %s1636_s17 = smov 0   ;;  %s1638_s18 = smov 0  }
   0x6 LB: > { %s1653_s19 = sadd.s32 4294967295, %s1590_s18   ;;  %s1375_s20 = sadd.s32 4294967294, %s1590_s18   ;;  %s1590_s18 = sphi %s1638_s18, %s2602_s18   ;;  %s1586_s17 = sphi %s1636_s17, %s2601_s17   ;;  %s1582_s16 = sphi %s1634_s16, %s2600_s16   ;;  %s1578_s15 = sphi %s1632_s15, %s2599_s15  }
   0x7   : > { %p41_p0 = scmp.ne.s32.totalorder %s1582_s16, %s1578_s15  ;;  %p2581_p1 = scmp.eq.s32.totalorder %s1653_s19, 0 }
   0x8   : > { %p134_p3 = scmp.eq.s32.totalorder %s1375_s20, 1  ;;  %p1376_p5 = scmp.ge.s32.totalorder %s1590_s18, 1 }
   0x9   : > { %p1662_p4 = por %p2581_p1, %p41_p0  ;;  %p141_p7 = scmp.lt.s32.totalorder %s1590_s18, 3 }
   0xa   : > { %p1667_p6 = por %p134_p3, %p41_p0  ;;  %s1592_s24 = smov [#allocation6]  }
   0xb   : > { %s2585_s21 = scalar_select %p1662_p4, 1, 0 }
   0xc   : > { %s2586_s22 = scalar_select %p1667_p6, 1, 0 }
   0xd   : > { %p1672_p8 = pnand %p1376_p5, %p141_p7  ;;  %s159_s25 = sshll.u32 %s1592_s24, 4  ;;  %s160_s25 = int_to_ptr.vmem [resolvable:$true] %s159_s25 }
   0xe   : > { %s1686_s27 = sadd.s32 1, %s1590_s18   ;;  %s28_s28 = sadd.s32 1, %s1586_s17 }
   0xf   : > { %s2587_s23 = scalar_select %p1672_p8, 1, 0 }
  0x10   : > { %p1402_p9 = pneg %p1672_p8  ;;  %s25_s29 = ssub.s32 %s1590_s18, %s1686_s27 }
  0x11   : > { %s1479_s30 = scalar_lea.vmem %s160_s25, 512  ;;  %p1487_p5 = scmp.lt.s32.totalorder %s160_s25, %s160_s25 }
  0x12   : > { %p1681_p11 = pnand %p1402_p9, %p2581_p1  ;;  %p1480_p13 = scmp.ne.s32.totalorder %s160_s25, %s1479_s30 }
  0x13   : > { %p1488_p7 = scmp.lt.s32.totalorder %s1479_s30, %s1479_s30 }
  0x14   : > { %p1470_p12 = pneg %p1681_p11 }
  0x15   : > { %p1489_p10 = por %p1488_p7, %p1487_p5 }
  0x16   : > { %p1482_p0 = pnand %p1480_p13, %p1470_p12 }
  0x18   : > { %p1483_p3 = pneg %p1482_p0 }
  0x1a   : > { %p1490_p2 = pnand %p1489_p10, %p1483_p3 }
  0x1c   : > { %1493 = shalt.err (!%p1490_p2)
}
  0x1d   : > { %s1593_s5 = smov 256   ;;  %s1594_s6 = smov 16  }
  0x1e   : > { %1405 = dma.hbm_to_vmem [thread:$0]  (!%p1681_p11), %s2579_s3, 512, %s160_s25, [#allocation7], %s1593_s5, %s1593_s5, %s1594_s6  }
  0x1f   : > { %p26_p9 = scmp.eq.s32.totalorder %s25_s29, 0  ;;  %p35_p12 = scmp.ne.s32.totalorder %s1586_s17, %s1582_s16 }
  0x20   : > { %p36_p10 = scmp.eq.s32.totalorder %s1590_s18, 0  ;;  %p1415_p2 = scmp.lt.s32.totalorder %s1590_s18, 2 }
  0x21   : > { %s1703_s9 = scalar_select %p26_p9, %s1586_s17, %s28_s28  }
  0x22   : > { %p37_p13 = por %p36_p10, %p35_p12  ;;  %p2589_p0 = scmp.eq.s32.totalorder %s1653_s19, 1 }
  0x23   : > { %s173_s11 = sand.u32 1, %s1586_s17   ;;  %s1392_s12 = sshll.u32 %s1590_s18, 8 }
  0x24   : > { %p1707_p3 = por %p2589_p0, %p35_p12  ;;  %s1379_s13 = sshll.u32 %s173_s11, 4 }
  0x25   : > { %s1716_s24 = scalar_lea.hbm %s2576_s0, %s1392_s12  ;;  %s177_s25 = scalar_lea.vmem [#allocation3], %s1379_s13 }
  0x26   : > { %s2590_s10 = scalar_select %p1707_p3, 1, 0 }
  0x27   : > { %s185_s26 = sshll.u32 %s177_s25, 4  ;;  %p1718_p11 = pnand %p1415_p2, %p37_p13  ;;  %s186_s26 = int_to_ptr.vmem [resolvable:$true] %s185_s26 }
  0x28   : > { %s174_s29 = scalar_lea.sflag [#allocation4], %s173_s11  ;;  %s1494_s30 = scalar_lea.hbm %s1716_s24, 256 }
  0x29   : > { %p1495_p5 = scmp.ne.s32.totalorder %s1716_s24, %s1494_s30  ;;  %p1496_p7 = pneg %p1718_p11 }
  0x2a   : > { %s1499_s7 = scalar_lea.hbm %s2576_s0, 512  ;;  %p1500_p10 = scmp.lt.s32.totalorder %s1716_s24, %s2576_s0 }
  0x2b   : > { %p1497_p9 = pnand %p1496_p7, %p1495_p5  ;;  %p1501_p2 = scmp.lt.s32.totalorder %s1499_s7, %s1494_s30 }
  0x2d   : > { %p1498_p12 = pneg %p1497_p9  ;;  %p1502_p13 = por %p1501_p2, %p1500_p10 }
  0x2f   : > { %p1503_p0 = pnand %p1502_p13, %p1498_p12 }
  0x31   : > { %1506 = shalt.err (!%p1503_p0)
}
  0x32   : > { %s1507_s13 = scalar_lea.vmem %s186_s26, 256  ;;  %s1595_s11 = smov [#allocation3]  }
  0x33   : > { %p1508_p1 = scmp.ne.s32.totalorder %s186_s26, %s1507_s13  ;;  %s1512_s14 = sshll.u32 %s1595_s11, 4  ;;  %s1513_s14 = int_to_ptr.vmem [resolvable:$false] %s1512_s14 }
  0x34   : > { %s1514_s20 = scalar_lea.vmem %s1513_s14, 512  ;;  %p1515_p5 = scmp.lt.s32.totalorder %s186_s26, %s1513_s14 }
  0x35   : > { %p1510_p6 = pnand %p1508_p1, %p1496_p7  ;;  %p1516_p9 = scmp.lt.s32.totalorder %s1514_s20, %s1507_s13 }
  0x37   : > { %p1511_p3 = pneg %p1510_p6  ;;  %p1517_p4 = por %p1516_p9, %p1515_p5 }
  0x39   : > { %p1518_p8 = pnand %p1517_p4, %p1511_p3 }
  0x3b   : > { %1521 = shalt.err (!%p1518_p8)
}
  0x3c   : > { %1409 = dma.hbm_to_vmem [thread:$0]  (!%p1718_p11), %s1716_s24, 256, %s186_s26, %s174_s29  }
  0x3d   : > { %p2592_p12 = scmp.ne.s32.totalorder %s2587_s23, 0 }
  0x3e   : > { %s1739_s25 = sand.u32 (!%p2592_p12), 1, %s1582_s16   ;;  %p2593_p1 = scmp.ne.s32.totalorder (!%p2592_p12), %s2585_s21, 0 }
  0x3f   : > { %194 = sbr.rel (%p2592_p12) target bundleno = 541 (0x21d), region = 36  ;;  %s1383_s30 = sshll.u32 (!%p2592_p12), %s1739_s25, 4 }
  0x40   : > { %s197_s5 = scalar_lea.sflag (!%p2592_p12), [#allocation4], %s1739_s25  ;;  %s200_s6 = scalar_lea.vmem (!%p2592_p12), [#allocation3], %s1383_s30 }
  0x44   : > { %1565 = dma.done.wait (%p2593_p1), %s197_s5, 256  }
  0x45   : > { %1567 = vsyncadd (%p2593_p1), %s197_s5, 4294967040  ;;  %p2594_p4 = scmp.eq.s32.totalorder %s1653_s19, 0 }
  0x47   : > { %1569 = dma.done.wait (%p2594_p4), [#allocation7], 512   ;;  %p2595_p6 = pmov %p2594_p4 }
  0x48   : > { %v1753_v0 = vld [vmem:[%s200_s6] sm:$0xff]  ;;  %s1596_s23 = smov 112   ;;  %s1597_s24 = smov 111   ;;  %v1757_v1 = vld [vmem:[%s200_s6 + $0x8] sm:$0xff]  ;;  %vm319_vm2 = vcmask 1041409   ;;  %vm322_vm3 = vcmask 1042434   ;;  %v245_v35 = vlaneseq }
  0x49   : > { %1571 = vsyncadd (%p2595_p6), [#allocation7], 4294966784  ;;  %968 = vrot.lane.b32.xlu1 %v1753_v0, %s1596_s23  ;;  %1071 = vrot.lane.b32.xlu0 %v1753_v0, %s1597_s24  ;;  %s1598_s21 = smov 113   ;;  %s1599_s26 = smov 127   ;;  %v1773_v2 = vld [vmem:[#allocation6 + $0x8] sm:$0xff]  ;;  %v669_v3 = vrot.slane %v1757_v1, 4 }
  0x4a   : > { %s1600_s28 = smov 1   ;;  %s1601_s29 = smov 15   ;;  %v671_v4 = vrot.slane %v1757_v1, 5  ;;  %v1777_v5 = vld [vmem:[#allocation6] sm:$0xff]  ;;  %v668_v6 = vrot.slane %v1753_v0, 4  ;;  %v670_v7 = vrot.slane %v1753_v0, 5 }
  0x4b   : > { %s1602_s7 = smov 16   ;;  %s1603_s8 = smov 17   ;;  %vm236_vm0 = vcmp.gt.f32.partialorder %v1773_v2, 0.5  ;;  %v673_v8 = vrot.slane %v1757_v1, 6  ;;  %vm235_vm1 = vcmp.gt.f32.partialorder %v1777_v5, 0.5  ;;  %v672_v11 = vrot.slane %v1753_v0, 6 }
  0x4c   : > { %v699_v9 = vsel %vm236_vm0, %v669_v3, 0.0  ;;  %v701_v10 = vsel %vm236_vm0, %v671_v4, 0.0  ;;  %v698_v12 = vsel %vm235_vm1, %v668_v6, 0.0  ;;  %v700_v13 = vsel %vm235_vm1, %v670_v7, 0.0  ;;  %v1841_v60 = vld [vmem:[#allocation6 + $0x18] sm:$0x1] }
  0x4d   : > { %970 = vrot.lane.b32.xlu1 %v1757_v1, %s1596_s23  ;;  %1073 = vrot.lane.b32.xlu0 %v1757_v1, %s1597_s24  ;;  %v675_v14 = vrot.slane %v1757_v1, 7  ;;  %v703_v15 = vsel %vm236_vm0, %v673_v8, 0.0  ;;  %v744_v16 = vrot.slane %v699_v9, 4  ;;  %v745_v17 = vrot.slane %v701_v10, 3  ;;  %v230_v63 = vld [vmem:[%s2578_s2] sm:$0xff]  ;;  %s1393_s20 = sshll.u32 %s1653_s19, 8 }
  0x4e   : > { %v674_v18 = vrot.slane %v1753_v0, 7  ;;  %v702_v19 = vsel %vm235_vm1, %v672_v11, 0.0  ;;  %v730_v20 = vrot.slane %v698_v12, 4  ;;  %v731_v21 = vrot.slane %v700_v13, 3  ;;  %v229_v5 = vld [vmem:[%s2577_s1] sm:$0xff]  ;;  %s228_s5 = scalar_lea.vmem [#allocation8], %s1383_s30 }
  0x4f   : > { %v705_v22 = vsel %vm236_vm0, %v675_v14, 0.0  ;;  %v747_v23 = vrot.slane %v703_v15, 2  ;;  %v746_v24 = vsel %vm319_vm2, %v745_v17, %v744_v16  ;;  %v733_v26 = vrot.slane %v702_v19, 2  ;;  %s1295_s6 = sshll.u32 %s228_s5, 4  ;;  %p2596_p3 = scmp.ne.s32.totalorder %s2590_s10, 0  ;;  %s1296_s6 = int_to_ptr.vmem [resolvable:$true] %s1295_s6 }
  0x50   : > { %v704_v25 = vsel %vm235_vm1, %v674_v18, 0.0  ;;  %v677_v27 = vrot.slane %v1757_v1, 1  ;;  %v732_v28 = vsel %vm319_vm2, %v731_v21, %v730_v20  ;;  %v749_v29 = vrot.slane %v705_v22, 1  ;;  %s1606_s19 = smov [#allocation8]  }
  0x51   : > { %867 = vrot.lane.b32.xlu1 %v1757_v1, %s1598_s21  ;;  %865 = vrot.lane.b32.xlu0 %v1753_v0, %s1598_s21  ;;  %v676_v30 = vrot.slane %v1753_v0, 1  ;;  %v748_v31 = vsel %vm322_vm3, %v747_v23, %v746_v24  ;;  %v735_v32 = vrot.slane %v704_v25, 1  ;;  %v679_v33 = vrot.slane %v1757_v1, 2  ;;  %s2539_s21 = scalar_lea.hbm %s2580_s4, %s1393_s20 }
  0x52   : > { %v734_v34 = vsel %vm322_vm3, %v733_v26, %v732_v28  ;;  %vm325_vm4 = vcmask 1043459   ;;  %v709_v36 = vsel %vm236_vm0, %v677_v27, 0.0  ;;  %v678_v37 = vrot.slane %v1753_v0, 2 }
  0x53   : > { %v707_v38 = vsel %vm236_vm0, %v1757_v1, 0.0  ;;  %v750_v39 = vsel %vm325_vm4, %v749_v29, %v748_v31  ;;  %v708_v40 = vsel %vm235_vm1, %v676_v30, 0.0  ;;  %v681_v41 = vrot.slane %v1757_v1, 3 }
  0x54   : > { %v706_v42 = vsel %vm235_vm1, %v1753_v0, 0.0  ;;  %v736_v43 = vsel %vm325_vm4, %v735_v32, %v734_v34  ;;  %vm328_vm5 = vcmask 1044484   ;;  %v711_v44 = vsel %vm236_vm0, %v679_v33, 0.0 }
  0x55   : > { %764 = vrot.lane.b32.xlu1 %v1757_v1, %s1599_s26  ;;  %762 = vrot.lane.b32.xlu0 %v1753_v0, %s1599_s26  ;;  %v752_v45 = vrot.slane %v709_v36, 7  ;;  %v680_v46 = vrot.slane %v1753_v0, 3  ;;  %v1827_v47 = vand.u32 127, %v245_v35  ;;  %v751_v48 = vsel %vm328_vm5, %v707_v38, %v750_v39  ;;  %s1281_s26 = scalar_lea.sflag [#allocation5], %s1739_s25 }
  0x56   : > { %v710_v49 = vsel %vm235_vm1, %v678_v37, 0.0  ;;  %v738_v50 = vrot.slane %v708_v40, 7  ;;  %v737_v51 = vsel %vm328_vm5, %v706_v42, %v736_v43  ;;  %vm331_vm6 = vcmask 1045509  }
  0x57   : > { %v713_v54 = vsel %vm236_vm0, %v681_v41, 0.0  ;;  %v754_v55 = vrot.slane %v711_v44, 6  ;;  %v753_v56 = vsel %vm331_vm6, %v752_v45, %v751_v48  ;;  %v712_v57 = vsel %vm235_vm1, %v680_v46, 0.0  ;;  %v1928_v45 = vld [vmem:[#allocation6 + $0x10] sm:$0x1] }
  0x58   : > { %v740_v58 = vrot.slane %v710_v49, 6  ;;  %vm972_vm7 = vcmp.lt.s32.totalorder %v1827_v47, 112  ;;  %vm1075_vm8 = vcmp.lt.s32.totalorder %v1827_v47, 111  ;;  %v739_v59 = vsel %vm331_vm6, %v738_v50, %v737_v51 }
  0x59   : > { %565 = vrot.lane.b32.xlu1 %v1757_v1, %s1600_s28  ;;  %563 = vrot.lane.b32.xlu0 %v1753_v0, %s1600_s28  ;;  %vm334_vm9 = vcmask 1046534   ;;  %v756_v61 = vrot.slane %v713_v54, 5  ;;  %v1604_v62 = vmov 0.0   ;;  %vm869_vm10 = vcmp.lt.s32.totalorder %v1827_v47, 113  ;;  %s1522_s28 = scalar_lea.vmem %s1296_s6, 256 }
  0x5a   : > { %1269 = vmatprep.mubr.f32.mxu0 %v1604_v62  ;;  %vm766_vm11 = vcmp.lt.s32.totalorder %v1827_v47, 127  ;;  %v755_v3 = vsel %vm334_vm9, %v754_v55, %v753_v56  ;;  %v742_v4 = vrot.slane %v712_v57, 5  ;;  %v1605_v6 = vmov 0   ;;  %p1523_p8 = scmp.ne.s32.totalorder %s1296_s6, %s1522_s28 }
  0x5b   : > { %1463 = vset.pattern.permute.xlu0 %v1605_v6  ;;  %v741_v10 = vsel %vm334_vm9, %v740_v58, %v739_v59  ;;  %vm238_vm12 = vcmp.gt.f32.partialorder %v1841_v60, 0.5  ;;  %vm337_vm13 = vcmask 1047559   ;;  %vm567_vm14 = vcmp.lt.s32.totalorder %v1827_v47, 1 }
  0x5c   : > { %v1873_v16 = vsel %vm337_vm13, %v756_v61, %v755_v3  ;;  %v1879_v22 = vsel %vm337_vm13, %v742_v4, %v741_v10  ;;  %vm237_vm15 = vcmp.gt.f32.partialorder %v1928_v45, 0.5  ;;  %p1524_p11 = pnand %p1523_p8, %p2596_p3 }
  0x5d   : > { %462 = vrot.lane.b32.xlu1 %v1757_v1, %s1601_s29  ;;  %460 = vrot.lane.b32.xlu0 %v1753_v0, %s1601_s29  ;;  %s1526_s29 = sshll.u32 %s1606_s19, 4  ;;  %s1527_s29 = int_to_ptr.vmem [resolvable:$false] %s1526_s29 }
  0x5e   : > { %p1525_p7 = pneg %p1524_p11  ;;  %s1528_s30 = scalar_lea.vmem %s1527_s29, 512 }
  0x5f   : > { %p1529_p10 = scmp.lt.s32.totalorder %s1296_s6, %s1527_s29  ;;  %p1530_p2 = scmp.lt.s32.totalorder %s1528_s30, %s1522_s28 }
  0x61   : > { %359 = vrot.lane.b32.xlu1 %v1757_v1, %s1602_s7  ;;  %357 = vrot.lane.b32.xlu0 %v1753_v0, %s1602_s7  ;;  %p1531_p13 = por %p1530_p2, %p1529_p10 }
  0x63   : > { %p1532_p0 = pnand %p1531_p13, %p1525_p7 }
  0x65   : > { %243 = vrot.lane.b32.xlu1 %v1757_v1, %s1603_s8  ;;  %241 = vrot.lane.b32.xlu0 %v1753_v0, %s1603_s8 }
  0x69   : > { %1198 = vperm.xlu0 %1463, %v230_v63  }
  0xbb   : > { %v969_v52 = vpop.permute.xlu1 %968  ;;  %v1072_v53 = vpop.permute.xlu0 %1071 }
  0xbf   : > { %v971_v0 = vpop.permute.xlu1 %970  ;;  %v1074_v1 = vpop.permute.xlu0 %1073 }
  0xc0   : > { %v1851_v7 = vsel %vm972_vm7, %v969_v52, %v971_v0  ;;  %v1855_v8 = vsel %vm972_vm7, %v971_v0, %v969_v52  ;;  %v1859_v9 = vsel %vm1075_vm8, %v1072_v53, %v1074_v1  ;;  %v1866_v13 = vsel %vm1075_vm8, %v1074_v1, %v1072_v53 }
  0xc1   : > { %v977_v11 = vrot.slane %v1851_v7, 1  ;;  %v978_v12 = vrot.slane %v1855_v8, 1  ;;  %v979_v14 = vrot.slane %v1851_v7, 2  ;;  %v980_v15 = vrot.slane %v1855_v8, 2 }
  0xc2   : > { %v981_v17 = vrot.slane %v1851_v7, 3  ;;  %v982_v18 = vrot.slane %v1855_v8, 3  ;;  %v1084_v19 = vrot.slane %v1859_v9, 1  ;;  %v1085_v24 = vrot.slane %v1866_v13, 1 }
  0xc3   : > { %v868_v20 = vpop.permute.xlu1 %867  ;;  %v866_v21 = vpop.permute.xlu0 %865  ;;  %v1883_v23 = vsel %vm235_vm1, %v977_v11, 0.0  ;;  %v1896_v27 = vsel %vm236_vm0, %v978_v12, 0.0  ;;  %v1903_v31 = vsel %vm235_vm1, %v979_v14, 0.0  ;;  %v1907_v32 = vsel %vm236_vm0, %v980_v15, 0.0 }
  0xc4   : > { %v1888_v25 = vsel %vm869_vm10, %v866_v21, %v868_v20  ;;  %v1892_v26 = vsel %vm869_vm10, %v868_v20, %v866_v21  ;;  %v1086_v33 = vrot.slane %v1859_v9, 2  ;;  %v1087_v39 = vrot.slane %v1866_v13, 2 }
  0xc5   : > { %v874_v28 = vrot.slane %v1888_v25, 2  ;;  %v875_v29 = vrot.slane %v1892_v26, 2  ;;  %v876_v30 = vrot.slane %v1888_v25, 3  ;;  %v877_v34 = vrot.slane %v1892_v26, 3 }
  0xc6   : > { %v878_v35 = vrot.slane %v1888_v25, 4  ;;  %v879_v36 = vrot.slane %v1892_v26, 4  ;;  %v1089_v40 = vrot.slane %v1866_v13, 3  ;;  %v1091_v44 = vrot.slane %v1866_v13, 4 }
  0xc7   : > { %v765_v37 = vpop.permute.xlu1 %764  ;;  %v763_v38 = vpop.permute.xlu0 %762  ;;  %v1917_v41 = vsel %vm235_vm1, %v874_v28, 0.0  ;;  %v1932_v46 = vsel %vm236_vm0, %v875_v29, 0.0  ;;  %v1936_v48 = vsel %vm235_vm1, %v876_v30, 0.0  ;;  %v1942_v51 = vsel %vm236_vm0, %v877_v34, 0.0 }
  0xc8   : > { %v1921_v42 = vsel %vm766_vm11, %v763_v38, %v765_v37  ;;  %v1925_v43 = vsel %vm766_vm11, %v765_v37, %v763_v38  ;;  %v1093_v54 = vrot.slane %v1866_v13, 5  ;;  %v1095_v59 = vrot.slane %v1866_v13, 6 }
  0xc9   : > { %v771_v49 = vrot.slane %v1921_v42, 3  ;;  %v772_v50 = vrot.slane %v1925_v43, 3  ;;  %v773_v52 = vrot.slane %v1921_v42, 4  ;;  %v774_v53 = vrot.slane %v1925_v43, 4 }
  0xca   : > { %v775_v55 = vrot.slane %v1921_v42, 5  ;;  %v776_v56 = vrot.slane %v1925_v43, 5  ;;  %v1097_v61 = vrot.slane %v1866_v13, 7  ;;  %v1115_v1 = vsel %vm238_vm12, %v1866_v13, 0.0 }
  0xcb   : > { %v566_v57 = vpop.permute.xlu1 %565  ;;  %v564_v58 = vpop.permute.xlu0 %563  ;;  %v1954_v62 = vsel %vm235_vm1, %v771_v49, 0.0  ;;  %v1969_v3 = vsel %vm236_vm0, %v772_v50, 0.0  ;;  %v1117_v10 = vsel %vm238_vm12, %v1085_v24, 0.0  ;;  %v1977_v11 = vsel %vm235_vm1, %v773_v52, 0.0 }
  0xcc   : > { %v1958_v63 = vsel %vm567_vm14, %v564_v58, %v566_v57  ;;  %v1962_v0 = vsel %vm567_vm14, %v566_v57, %v564_v58  ;;  %v1981_v12 = vsel %vm236_vm0, %v774_v53, 0.0  ;;  %v1119_v14 = vsel %vm238_vm12, %v1087_v39, 0.0 }
  0xcd   : > { %v572_v4 = vrot.slane %v1962_v0, 5  ;;  %v573_v6 = vrot.slane %v1958_v63, 5  ;;  %v574_v13 = vrot.slane %v1962_v0, 6  ;;  %vm464_vm7 = vcmp.lt.s32.totalorder %v1827_v47, 15 }
  0xce   : > { %v575_v15 = vrot.slane %v1958_v63, 6  ;;  %v576_v20 = vrot.slane %v1962_v0, 7  ;;  %v1121_v21 = vsel %vm238_vm12, %v1089_v40, 0.0  ;;  %v1123_v24 = vsel %vm238_vm12, %v1091_v44, 0.0 }
  0xcf   : > { %v577_v28 = vrot.slane %v1958_v63, 7  ;;  %v1996_v29 = vsel %vm235_vm1, %v572_v4, 0.0  ;;  %v1125_v30 = vsel %vm238_vm12, %v1093_v54, 0.0  ;;  %v1160_v34 = vrot.slane %v1117_v10, 7 }
  0xd0   : > { %v2002_v37 = vsel %vm236_vm0, %v573_v6, 0.0  ;;  %v1127_v38 = vsel %vm238_vm12, %v1095_v59, 0.0  ;;  %v1129_v39 = vsel %vm238_vm12, %v1097_v61, 0.0  ;;  %v1162_v40 = vrot.slane %v1119_v14, 6 }
  0xd1   : > { %v1161_v44 = vsel %vm319_vm2, %v1160_v34, %v1115_v1  ;;  %v1164_v49 = vrot.slane %v1121_v21, 5  ;;  %v1166_v50 = vrot.slane %v1123_v24, 4  ;;  %v1088_v52 = vrot.slane %v1859_v9, 3  ;;  %v463_v34 = vpop.permute.xlu1 %462 }
  0xd2   : > { %v1163_v53 = vsel %vm322_vm3, %v1162_v40, %v1161_v44  ;;  %v1168_v54 = vrot.slane %v1125_v30, 3  ;;  %v1090_v57 = vrot.slane %v1859_v9, 4  ;;  %v1092_v58 = vrot.slane %v1859_v9, 5 }
  0xd3   : > { %v1165_v4 = vsel %vm325_vm4, %v1164_v49, %v1163_v53  ;;  %v1094_v59 = vrot.slane %v1859_v9, 6  ;;  %v1096_v60 = vrot.slane %v1859_v9, 7  ;;  %v1116_v61 = vsel %vm237_vm15, %v1084_v19, 0.0 }
  0xd4   : > { %v2022_v1 = vsel %vm235_vm1, %v574_v13, 0.0  ;;  %v1167_v6 = vsel %vm328_vm5, %v1166_v50, %v1165_v4  ;;  %v1170_v10 = vrot.slane %v1127_v38, 2  ;;  %v1118_v14 = vsel %vm237_vm15, %v1086_v33, 0.0  ;;  %v461_v13 = vpop.permute.xlu0 %460 }
  0xd5   : > { %v1169_v21 = vsel %vm331_vm6, %v1168_v54, %v1167_v6  ;;  %v1172_v24 = vrot.slane %v1129_v39, 1  ;;  %v1120_v30 = vsel %vm237_vm15, %v1088_v52, 0.0  ;;  %v1122_v19 = vsel %vm237_vm15, %v1090_v57, 0.0 }
  0xd6   : > { %v1171_v40 = vsel %vm334_vm9, %v1170_v10, %v1169_v21  ;;  %v1124_v38 = vsel %vm237_vm15, %v1092_v58, 0.0  ;;  %v1146_v44 = vrot.slane %v1116_v61, 7  ;;  %v1148_v49 = vrot.slane %v1118_v14, 6 }
  0xd7   : > { %v1173_v33 = vsel %vm337_vm13, %v1172_v24, %v1171_v40  ;;  %v1114_v39 = vsel %vm237_vm15, %v1859_v9, 0.0  ;;  %v1126_v50 = vsel %vm237_vm15, %v1094_v59, 0.0  ;;  %v1128_v52 = vsel %vm237_vm15, %v1096_v60, 0.0 }
  0xd8   : > { %1219 = vmatprep.subr.mxu0 %v1173_v33  ;;  %v1147_v53 = vsel %vm319_vm2, %v1146_v44, %v1114_v39  ;;  %v1150_v54 = vrot.slane %v1120_v30, 5  ;;  %v2048_v57 = vsel %vm464_vm7, %v461_v13, %v463_v34  ;;  %v2052_v58 = vsel %vm464_vm7, %v463_v34, %v461_v13 }
  0xd9   : > { %v2056_v9 = vsel %vm236_vm0, %v575_v15, 0.0  ;;  %v1149_v4 = vsel %vm322_vm3, %v1148_v49, %v1147_v53  ;;  %v1152_v45 = vrot.slane %v1122_v19, 4  ;;  %v1154_v59 = vrot.slane %v1124_v38, 3 }
  0xda   : > { %v1151_v60 = vsel %vm325_vm4, %v1150_v54, %v1149_v4  ;;  %v469_v61 = vrot.slane %v2052_v58, 6  ;;  %v984_v6 = vrot.slane %v1855_v8, 4  ;;  %v986_v10 = vrot.slane %v1855_v8, 5 }
  0xdb   : > { %v1153_v14 = vsel %vm328_vm5, %v1152_v45, %v1151_v60  ;;  %v1156_v21 = vrot.slane %v1126_v50, 2  ;;  %v1158_v24 = vrot.slane %v1128_v52, 1  ;;  %v470_v30 = vrot.slane %v2048_v57, 6 }
  0xdc   : > { %v1155_v15 = vsel %vm331_vm6, %v1154_v59, %v1153_v14  ;;  %v471_v34 = vrot.slane %v2052_v58, 7  ;;  %v988_v19 = vrot.slane %v1855_v8, 6  ;;  %v990_v13 = vrot.slane %v1855_v8, 7 }
  0xdd   : > { %v1157_v40 = vsel %vm334_vm9, %v1156_v21, %v1155_v15  ;;  %v1012_v38 = vsel %vm236_vm0, %v982_v18, 0.0  ;;  %v1014_v44 = vsel %vm236_vm0, %v984_v6, 0.0  ;;  %v1016_v49 = vsel %vm236_vm0, %v986_v10, 0.0 }
  0xde   : > { %v1159_v33 = vsel %vm337_vm13, %v1158_v24, %v1157_v40  ;;  %v472_v39 = vrot.slane %v2048_v57, 7  ;;  %v2082_v50 = vsel %vm235_vm1, %v469_v61, 0.0  ;;  %v1018_v52 = vsel %vm236_vm0, %v988_v19, 0.0 }
  0xdf   : > { %1220 = vmatpush1.msra.mxu0 %v1159_v33  ;;  %v1020_v18 = vsel %vm236_vm0, %v990_v13, 0.0  ;;  %v1053_v53 = vrot.slane %v1896_v27, 7  ;;  %v1054_v54 = vrot.slane %v1907_v32, 6  ;;  %v1056_v4 = vrot.slane %v1012_v38, 5 }
  0xe0   : > { %v1022_v45 = vsel %vm236_vm0, %v1855_v8, 0.0  ;;  %v1058_v59 = vrot.slane %v1014_v44, 4  ;;  %v1060_v60 = vrot.slane %v1016_v49, 3  ;;  %v983_v61 = vrot.slane %v1851_v7, 4 }
  0xe1   : > { %v1055_v6 = vsel %vm319_vm2, %v1054_v54, %v1053_v53  ;;  %v985_v10 = vrot.slane %v1851_v7, 5  ;;  %v987_v14 = vrot.slane %v1851_v7, 6  ;;  %v989_v21 = vrot.slane %v1851_v7, 7 }
  0xe2   : > { %v1057_v27 = vsel %vm322_vm3, %v1056_v4, %v1055_v6  ;;  %v1062_v32 = vrot.slane %v1018_v52, 2  ;;  %v1011_v8 = vsel %vm235_vm1, %v981_v17, 0.0  ;;  %v1013_v24 = vsel %vm235_vm1, %v983_v61, 0.0 }
  0xe3   : > { %v1059_v15 = vsel %vm325_vm4, %v1058_v59, %v1057_v27  ;;  %v1064_v19 = vrot.slane %v1020_v18, 1  ;;  %v1015_v13 = vsel %vm235_vm1, %v985_v10, 0.0  ;;  %v1021_v40 = vsel %vm235_vm1, %v1851_v7, 0.0 }
  0xe4   : > { %v1061_v38 = vsel %vm328_vm5, %v1060_v60, %v1059_v15  ;;  %v1039_v44 = vrot.slane %v1883_v23, 7  ;;  %v1040_v49 = vrot.slane %v1903_v31, 6  ;;  %v1042_v17 = vrot.slane %v1011_v8, 5 }
  0xe5   : > { %v1063_v33 = vsel %vm331_vm6, %v1062_v32, %v1061_v38  ;;  %v1017_v52 = vsel %vm235_vm1, %v987_v14, 0.0  ;;  %v1019_v18 = vsel %vm235_vm1, %v989_v21, 0.0  ;;  %v1044_v53 = vrot.slane %v1013_v24, 4 }
  0xe6   : > { %v1065_v54 = vsel %vm334_vm9, %v1064_v19, %v1063_v33  ;;  %v1041_v7 = vsel %vm319_vm2, %v1040_v49, %v1039_v44  ;;  %v1046_v4 = vrot.slane %v1015_v13, 3  ;;  %v881_v59 = vrot.slane %v1892_v26, 5 }
  0xe7   : > { %v1066_v23 = vsel %vm337_vm13, %v1022_v45, %v1065_v54  ;;  %v1043_v31 = vsel %vm322_vm3, %v1042_v17, %v1041_v7  ;;  %v883_v60 = vrot.slane %v1892_v26, 6  ;;  %v885_v61 = vrot.slane %v1892_v26, 7 }
  0xe8   : > { %1221 = vmatprep.subr.mxu0 %v1066_v23  ;;  %v1045_v6 = vsel %vm325_vm4, %v1044_v53, %v1043_v31  ;;  %v1048_v10 = vrot.slane %v1017_v52, 2  ;;  %v887_v14 = vrot.slane %v1892_v26, 1  ;;  %v909_v21 = vsel %vm236_vm0, %v879_v36, 0.0 }
  0xe9   : > { %vm361_vm8 = vcmp.lt.s32.totalorder %v1827_v47, 16  ;;  %v1047_v45 = vsel %vm328_vm5, %v1046_v4, %v1045_v6  ;;  %v1050_v27 = vrot.slane %v1019_v18, 1  ;;  %v911_v32 = vsel %vm236_vm0, %v881_v59, 0.0 }
  0xea   : > { %v913_v8 = vsel %vm236_vm0, %v883_v60, 0.0  ;;  %v1049_v24 = vsel %vm331_vm6, %v1048_v10, %v1047_v45  ;;  %v915_v15 = vsel %vm236_vm0, %v885_v61, 0.0  ;;  %v950_v19 = vrot.slane %v1932_v46, 6 }
  0xeb   : > { %v951_v36 = vrot.slane %v1942_v51, 5  ;;  %v1051_v13 = vsel %vm334_vm9, %v1050_v27, %v1049_v24  ;;  %v917_v38 = vsel %vm236_vm0, %v1892_v26, 0.0  ;;  %v919_v44 = vsel %vm236_vm0, %v887_v14, 0.0 }
  0xec   : > { %v953_v49 = vrot.slane %v909_v21, 4  ;;  %v1052_v17 = vsel %vm337_vm13, %v1021_v40, %v1051_v13  ;;  %v955_v52 = vrot.slane %v911_v32, 3  ;;  %v957_v18 = vrot.slane %v913_v8, 2  ;;  %v360_v21 = vpop.permute.xlu1 %359 }
  0xed   : > { %v952_v33 = vsel %vm319_vm2, %v951_v36, %v950_v19  ;;  %1222 = vmatpush1.msra.mxu0 %v1052_v17  ;;  %v880_v51 = vrot.slane %v1888_v25, 5  ;;  %v882_v53 = vrot.slane %v1888_v25, 6  ;;  %v884_v54 = vrot.slane %v1888_v25, 7 }
  0xee   : > { %v954_v46 = vsel %vm322_vm3, %v953_v49, %v952_v33  ;;  %v959_v7 = vrot.slane %v915_v15, 1  ;;  %v886_v4 = vrot.slane %v1888_v25, 1  ;;  %v908_v40 = vsel %vm235_vm1, %v878_v35, 0.0  ;;  %v358_v35 = vpop.permute.xlu0 %357 }
  0xef   : > { %v956_v26 = vsel %vm325_vm4, %v955_v52, %v954_v46  ;;  %v962_v23 = vrot.slane %v919_v44, 7  ;;  %v910_v31 = vsel %vm235_vm1, %v880_v51, 0.0  ;;  %v912_v60 = vsel %vm235_vm1, %v882_v53, 0.0 }
  0xf0   : > { %v958_v59 = vsel %vm328_vm5, %v957_v18, %v956_v26  ;;  %v914_v6 = vsel %vm235_vm1, %v884_v54, 0.0  ;;  %v936_v10 = vrot.slane %v1917_v41, 6  ;;  %v937_v14 = vrot.slane %v1936_v48, 5 }
  0xf1   : > { %v960_v61 = vsel %vm331_vm6, %v959_v7, %v958_v59  ;;  %v2175_v45 = vsel %vm236_vm0, %v470_v30, 0.0  ;;  %v2181_v27 = vsel %vm235_vm1, %v471_v34, 0.0  ;;  %v939_v8 = vrot.slane %v908_v40, 4 }
  0xf2   : > { %v961_v32 = vsel %vm334_vm9, %v917_v38, %v960_v61  ;;  %v918_v48 = vsel %vm235_vm1, %v886_v4, 0.0  ;;  %v938_v24 = vsel %vm319_vm2, %v937_v14, %v936_v10  ;;  %v941_v15 = vrot.slane %v910_v31, 3 }
  0xf3   : > { %v963_v41 = vsel %vm337_vm13, %v962_v23, %v961_v32  ;;  %v940_v30 = vsel %vm322_vm3, %v939_v8, %v938_v24  ;;  %v943_v19 = vrot.slane %v912_v60, 2  ;;  %v945_v36 = vrot.slane %v914_v6, 1 }
  0xf4   : > { %1223 = vmatprep.subr.mxu0 %v963_v41  ;;  %v2191_v34 = vsel %vm361_vm8, %v360_v21, %v358_v35  ;;  %v942_v13 = vsel %vm325_vm4, %v941_v15, %v940_v30  ;;  %v2196_v38 = vsel %vm361_vm8, %v358_v35, %v360_v21  ;;  %v778_v49 = vrot.slane %v1925_v43, 6 }
  0xf5   : > { %v366_v44 = vrot.slane %v2191_v34, 7  ;;  %v2204_v17 = vsel %vm236_vm0, %v472_v39, 0.0  ;;  %v916_v33 = vsel %vm235_vm1, %v1888_v25, 0.0  ;;  %v944_v52 = vsel %vm328_vm5, %v943_v19, %v942_v13 }
  0xf6   : > { %v780_v18 = vrot.slane %v1925_v43, 7  ;;  %v946_v46 = vsel %vm331_vm6, %v945_v36, %v944_v52  ;;  %v948_v51 = vrot.slane %v918_v48, 7  ;;  %v782_v53 = vrot.slane %v1925_v43, 1  ;;  %v242_v52 = vpop.permute.xlu0 %241 }
  0xf7   : > { %v784_v54 = vrot.slane %v1925_v43, 2  ;;  %vm247_vm10 = vcmp.lt.s32.totalorder %v1827_v47, 17  ;;  %v947_v39 = vsel %vm334_vm9, %v916_v33, %v946_v46  ;;  %v367_v26 = vrot.slane %v2196_v38, 7  ;;  %v244_v33 = vpop.permute.xlu1 %243 }
  0xf8   : > { %v368_v7 = vrot.slane %v2191_v34, 1  ;;  %v806_v25 = vsel %vm236_vm0, %v776_v56, 0.0  ;;  %v949_v4 = vsel %vm337_vm13, %v948_v51, %v947_v39  ;;  %v369_v40 = vrot.slane %v2196_v38, 1 }
  0xf9   : > { %v2226_v59 = vsel %vm235_vm1, %v366_v44, 0.0  ;;  %v808_v23 = vsel %vm236_vm0, %v778_v49, 0.0  ;;  %1224 = vmatpush1.msra.mxu0 %v949_v4  ;;  %v810_v31 = vsel %vm236_vm0, %v780_v18, 0.0  ;;  %v847_v60 = vrot.slane %v1969_v3, 5 }
  0xfa   : > { %v848_v61 = vrot.slane %v1981_v12, 4  ;;  %v850_v56 = vrot.slane %v806_v25, 3  ;;  %v812_v6 = vsel %vm236_vm0, %v1925_v43, 0.0  ;;  %v814_v10 = vsel %vm236_vm0, %v782_v53, 0.0 }
  0xfb   : > { %v816_v14 = vsel %vm236_vm0, %v784_v54, 0.0  ;;  %v777_v21 = vrot.slane %v1921_v42, 6  ;;  %v852_v32 = vrot.slane %v808_v23, 2  ;;  %v779_v3 = vrot.slane %v1921_v42, 7 }
  0xfc   : > { %v849_v35 = vsel %vm319_vm2, %v848_v61, %v847_v60  ;;  %v781_v12 = vrot.slane %v1921_v42, 1  ;;  %v854_v41 = vrot.slane %v810_v31, 1  ;;  %v783_v43 = vrot.slane %v1921_v42, 2 }
  0xfd   : > { %v851_v8 = vsel %vm322_vm3, %v850_v56, %v849_v35  ;;  %v805_v48 = vsel %vm235_vm1, %v775_v55, 0.0  ;;  %v857_v15 = vrot.slane %v814_v10, 7  ;;  %v807_v30 = vsel %vm235_vm1, %v777_v21, 0.0 }
  0xfe   : > { %v853_v24 = vsel %vm325_vm4, %v852_v32, %v851_v8  ;;  %v809_v19 = vsel %vm235_vm1, %v779_v3, 0.0  ;;  %v833_v13 = vrot.slane %v1954_v62, 5  ;;  %v834_v44 = vrot.slane %v1977_v11, 4 }
  0xff   : > { %v855_v36 = vsel %vm328_vm5, %v854_v41, %v853_v24  ;;  %v836_v49 = vrot.slane %v805_v48, 3  ;;  %v2261_v55 = vsel %vm236_vm0, %v367_v26, 0.0  ;;  %v859_v46 = vrot.slane %v816_v14, 6 }
 0x100   : > { %v856_v18 = vsel %vm331_vm6, %v812_v6, %v855_v36  ;;  %v813_v51 = vsel %vm235_vm1, %v781_v12, 0.0  ;;  %v815_v62 = vsel %vm235_vm1, %v783_v43, 0.0  ;;  %v835_v11 = vsel %vm319_vm2, %v834_v44, %v833_v13 }
 0x101   : > { %v858_v53 = vsel %vm334_vm9, %v857_v15, %v856_v18  ;;  %v838_v54 = vrot.slane %v807_v30, 2  ;;  %v837_v25 = vsel %vm322_vm3, %v836_v49, %v835_v11  ;;  %v840_v26 = vrot.slane %v809_v19, 1 }
 0x102   : > { %v860_v39 = vsel %vm337_vm13, %v859_v46, %v858_v53  ;;  %v2274_v4 = vsel %vm247_vm10, %v242_v52, %v244_v33  ;;  %v811_v23 = vsel %vm235_vm1, %v1921_v42, 0.0  ;;  %v843_v60 = vrot.slane %v813_v51, 7 }
 0x103   : > { %1225 = vmatprep.subr.mxu0 %v860_v39  ;;  %v839_v31 = vsel %vm325_vm4, %v838_v54, %v837_v25  ;;  %v2282_v61 = vsel %vm247_vm10, %v244_v33, %v242_v52  ;;  %v845_v6 = vrot.slane %v815_v62, 6  ;;  %v579_v10 = vrot.slane %v1958_v63, 1 }
 0x104   : > { %v841_v56 = vsel %vm328_vm5, %v840_v26, %v839_v31  ;;  %v581_v14 = vrot.slane %v1958_v63, 2  ;;  %v257_v35 = vrot.slane %v2274_v4, 1  ;;  %v583_v42 = vrot.slane %v1958_v63, 3 }
 0x105   : > { %v842_v21 = vsel %vm331_vm6, %v811_v23, %v841_v56  ;;  %v585_v32 = vrot.slane %v1958_v63, 4  ;;  %v256_v47 = vrot.slane %v2282_v61, 1  ;;  %v607_v12 = vsel %vm236_vm0, %v577_v28, 0.0 }
 0x106   : > { %v844_v3 = vsel %vm334_vm9, %v843_v60, %v842_v21  ;;  %v611_v8 = vsel %vm236_vm0, %v579_v10, 0.0  ;;  %v258_v43 = vrot.slane %v2282_v61, 2  ;;  %v259_v48 = vrot.slane %v2274_v4, 2 }
 0x107   : > { %v846_v41 = vsel %vm337_vm13, %v845_v6, %v844_v3  ;;  %v613_v24 = vsel %vm236_vm0, %v581_v14, 0.0  ;;  %v615_v15 = vsel %vm236_vm0, %v583_v42, 0.0  ;;  %v648_v30 = vrot.slane %v2002_v37, 3 }
 0x108   : > { %1226 = vmatpush1.msra.mxu0 %v846_v41  ;;  %v649_v28 = vrot.slane %v2056_v9, 2  ;;  %v651_v19 = vrot.slane %v607_v12, 1  ;;  %v609_v36 = vsel %vm236_vm0, %v1958_v63, 0.0  ;;  %v617_v13 = vsel %vm236_vm0, %v585_v32, 0.0 }
 0x109   : > { %1227 = vmatprep.subr.mxu0 %v1873_v16  ;;  %v654_v44 = vrot.slane %v611_v8, 7  ;;  %v578_v49 = vrot.slane %v1962_v0, 1  ;;  %v580_v37 = vrot.slane %v1962_v0, 2  ;;  %v582_v9 = vrot.slane %v1962_v0, 3 }
 0x10a   : > { %1228 = vmatpush1.msra.mxu0 %v1879_v22  ;;  %v650_v33 = vsel %vm319_vm2, %v649_v28, %v648_v30  ;;  %v584_v16 = vrot.slane %v1962_v0, 4  ;;  %v656_v18 = vrot.slane %v613_v24, 6  ;;  %v658_v63 = vrot.slane %v615_v15, 5 }
 0x10b   : > { %v652_v52 = vsel %vm322_vm3, %v651_v19, %v650_v33  ;;  %v606_v46 = vsel %vm235_vm1, %v576_v20, 0.0  ;;  %v660_v22 = vrot.slane %v617_v13, 4  ;;  %v608_v53 = vsel %vm235_vm1, %v1962_v0, 0.0 }
 0x10c   : > { %v653_v51 = vsel %vm325_vm4, %v609_v36, %v652_v52  ;;  %v610_v62 = vsel %vm235_vm1, %v578_v49, 0.0  ;;  %v634_v54 = vrot.slane %v1996_v29, 3  ;;  %v635_v39 = vrot.slane %v2022_v1, 2 }
 0x10d   : > { %v655_v11 = vsel %vm328_vm5, %v654_v44, %v653_v51  ;;  %v637_v25 = vrot.slane %v606_v46, 1  ;;  %v612_v20 = vsel %vm235_vm1, %v580_v37, 0.0  ;;  %v614_v23 = vsel %vm235_vm1, %v582_v9, 0.0 }
 0x10e   : > { %v657_v26 = vsel %vm331_vm6, %v656_v18, %v655_v11  ;;  %v616_v0 = vsel %vm235_vm1, %v584_v16, 0.0  ;;  %v636_v60 = vsel %vm319_vm2, %v635_v39, %v634_v54  ;;  %v640_v56 = vrot.slane %v610_v62, 7 }
 0x10f   : > { %v659_v31 = vsel %vm334_vm9, %v658_v63, %v657_v26  ;;  %v474_v29 = vrot.slane %v2048_v57, 1  ;;  %v638_v6 = vsel %vm322_vm3, %v637_v25, %v636_v60  ;;  %v476_v10 = vrot.slane %v2048_v57, 2 }
 0x110   : > { %v661_v1 = vsel %vm337_vm13, %v660_v22, %v659_v31  ;;  %v478_v14 = vrot.slane %v2048_v57, 3  ;;  %v639_v21 = vsel %vm325_vm4, %v608_v53, %v638_v6  ;;  %v642_v42 = vrot.slane %v612_v20, 6 }
 0x111   : > { %1229 = vmatprep.subr.mxu0 %v661_v1  ;;  %v480_v32 = vrot.slane %v2048_v57, 4  ;;  %v482_v3 = vrot.slane %v2048_v57, 5  ;;  %v641_v12 = vsel %vm328_vm5, %v640_v56, %v639_v21  ;;  %v644_v8 = vrot.slane %v614_v23, 5 }
 0x112   : > { %v506_v41 = vsel %vm236_vm0, %v474_v29, 0.0  ;;  %v508_v24 = vsel %vm236_vm0, %v476_v10, 0.0  ;;  %v643_v15 = vsel %vm331_vm6, %v642_v42, %v641_v12  ;;  %v646_v30 = vrot.slane %v616_v0, 4 }
 0x113   : > { %v504_v28 = vsel %vm236_vm0, %v2048_v57, 0.0  ;;  %v545_v19 = vrot.slane %v2175_v45, 2  ;;  %v645_v36 = vsel %vm334_vm9, %v644_v8, %v643_v15  ;;  %v510_v13 = vsel %vm236_vm0, %v478_v14, 0.0 }
 0x114   : > { %v512_v44 = vsel %vm236_vm0, %v480_v32, 0.0  ;;  %v546_v49 = vrot.slane %v2204_v17, 1  ;;  %v647_v33 = vsel %vm337_vm13, %v646_v30, %v645_v36  ;;  %v514_v37 = vsel %vm236_vm0, %v482_v3, 0.0 }
 0x115   : > { %v549_v9 = vrot.slane %v506_v41, 7  ;;  %v551_v16 = vrot.slane %v508_v24, 6  ;;  %1230 = vmatpush1.msra.mxu0 %v647_v33  ;;  %v473_v45 = vrot.slane %v2052_v58, 1  ;;  %v475_v52 = vrot.slane %v2052_v58, 2 }
 0x116   : > { %v547_v57 = vsel %vm319_vm2, %v546_v49, %v545_v19  ;;  %v477_v18 = vrot.slane %v2052_v58, 3  ;;  %v553_v46 = vrot.slane %v510_v13, 5  ;;  %v479_v17 = vrot.slane %v2052_v58, 4 }
 0x117   : > { %v548_v63 = vsel %vm322_vm3, %v504_v28, %v547_v57  ;;  %v481_v51 = vrot.slane %v2052_v58, 5  ;;  %v555_v53 = vrot.slane %v512_v44, 4  ;;  %v505_v62 = vsel %vm235_vm1, %v473_v45, 0.0 }
 0x118   : > { %v550_v22 = vsel %vm325_vm4, %v549_v9, %v548_v63  ;;  %v507_v11 = vsel %vm235_vm1, %v475_v52, 0.0  ;;  %v557_v39 = vrot.slane %v514_v37, 3  ;;  %v503_v25 = vsel %vm235_vm1, %v2052_v58, 0.0 }
 0x119   : > { %v552_v54 = vsel %vm328_vm5, %v551_v16, %v550_v22  ;;  %v531_v26 = vrot.slane %v2082_v50, 2  ;;  %v509_v23 = vsel %vm235_vm1, %v477_v18, 0.0  ;;  %v511_v0 = vsel %vm235_vm1, %v479_v17, 0.0 }
 0x11a   : > { %v554_v20 = vsel %vm331_vm6, %v553_v46, %v552_v54  ;;  %v532_v31 = vrot.slane %v2181_v27, 1  ;;  %v513_v56 = vsel %vm235_vm1, %v481_v51, 0.0  ;;  %v535_v29 = vrot.slane %v505_v62, 7 }
 0x11b   : > { %v556_v60 = vsel %vm334_vm9, %v555_v53, %v554_v20  ;;  %v537_v1 = vrot.slane %v507_v11, 6  ;;  %v371_v6 = vrot.slane %v2196_v38, 2  ;;  %v373_v10 = vrot.slane %v2196_v38, 3 }
 0x11c   : > { %v558_v58 = vsel %vm337_vm13, %v557_v39, %v556_v60  ;;  %v533_v50 = vsel %vm319_vm2, %v532_v31, %v531_v26  ;;  %v375_v27 = vrot.slane %v2196_v38, 4  ;;  %v377_v21 = vrot.slane %v2196_v38, 5 }
 0x11d   : > { %1231 = vmatprep.subr.mxu0 %v558_v58  ;;  %v534_v14 = vsel %vm322_vm3, %v503_v25, %v533_v50  ;;  %v379_v42 = vrot.slane %v2196_v38, 6  ;;  %v539_v3 = vrot.slane %v509_v23, 5  ;;  %v541_v12 = vrot.slane %v511_v0, 4 }
 0x11e   : > { %v536_v32 = vsel %vm325_vm4, %v535_v29, %v534_v14  ;;  %v401_v8 = vsel %vm236_vm0, %v369_v40, 0.0  ;;  %v543_v24 = vrot.slane %v513_v56, 3  ;;  %v403_v15 = vsel %vm236_vm0, %v371_v6, 0.0 }
 0x11f   : > { %v538_v41 = vsel %vm328_vm5, %v537_v1, %v536_v32  ;;  %v405_v30 = vsel %vm236_vm0, %v373_v10, 0.0  ;;  %v407_v19 = vsel %vm236_vm0, %v375_v27, 0.0  ;;  %v442_v36 = vrot.slane %v2261_v55, 1 }
 0x120   : > { %v540_v28 = vsel %vm331_vm6, %v539_v3, %v538_v41  ;;  %v444_v13 = vrot.slane %v401_v8, 7  ;;  %v399_v40 = vsel %vm236_vm0, %v2196_v38, 0.0  ;;  %v409_v49 = vsel %vm236_vm0, %v377_v21, 0.0 }
 0x121   : > { %v542_v44 = vsel %vm334_vm9, %v541_v12, %v540_v28  ;;  %v411_v33 = vsel %vm236_vm0, %v379_v42, 0.0  ;;  %v443_v9 = vsel %vm319_vm2, %v399_v40, %v442_v36  ;;  %v446_v16 = vrot.slane %v403_v15, 6 }
 0x122   : > { %v544_v37 = vsel %vm337_vm13, %v543_v24, %v542_v44  ;;  %v448_v57 = vrot.slane %v405_v30, 5  ;;  %v445_v55 = vsel %vm322_vm3, %v444_v13, %v443_v9  ;;  %v450_v45 = vrot.slane %v407_v19, 4 }
 0x123   : > { %1232 = vmatpush1.msra.mxu0 %v544_v37  ;;  %v370_v52 = vrot.slane %v2191_v34, 2  ;;  %v372_v38 = vrot.slane %v2191_v34, 3  ;;  %v447_v18 = vsel %vm325_vm4, %v446_v16, %v445_v55  ;;  %v374_v63 = vrot.slane %v2191_v34, 4 }
 0x124   : > { %v376_v46 = vrot.slane %v2191_v34, 5  ;;  %v378_v17 = vrot.slane %v2191_v34, 6  ;;  %v289_v51 = vsel %vm236_vm0, %v257_v35, 0.0  ;;  %v449_v22 = vsel %vm328_vm5, %v448_v57, %v447_v18 }
 0x125   : > { %v452_v53 = vrot.slane %v409_v49, 3  ;;  %v400_v62 = vsel %vm235_vm1, %v368_v7, 0.0  ;;  %v451_v11 = vsel %vm331_vm6, %v450_v45, %v449_v22  ;;  %v454_v54 = vrot.slane %v411_v33, 2 }
 0x126   : > { %v398_v39 = vsel %vm235_vm1, %v2191_v34, 0.0  ;;  %v402_v25 = vsel %vm235_vm1, %v370_v52, 0.0  ;;  %v404_v26 = vsel %vm235_vm1, %v372_v38, 0.0  ;;  %v428_v20 = vrot.slane %v2226_v59, 1 }
 0x127   : > { %v453_v35 = vsel %vm334_vm9, %v452_v53, %v451_v11  ;;  %v430_v23 = vrot.slane %v400_v62, 7  ;;  %v406_v0 = vsel %vm235_vm1, %v374_v63, 0.0  ;;  %v408_v31 = vsel %vm235_vm1, %v376_v46, 0.0 }
 0x128   : > { %v455_v7 = vsel %vm337_vm13, %v454_v54, %v453_v35  ;;  %v410_v34 = vsel %vm235_vm1, %v378_v17, 0.0  ;;  %v429_v60 = vsel %vm319_vm2, %v398_v39, %v428_v20  ;;  %v432_v56 = vrot.slane %v402_v25, 6 }
 0x129   : > { %1233 = vmatprep.subr.mxu0 %v455_v7  ;;  %v261_v29 = vrot.slane %v2274_v4, 3  ;;  %v263_v59 = vrot.slane %v2274_v4, 4  ;;  %v431_v1 = vsel %vm322_vm3, %v430_v23, %v429_v60  ;;  %v434_v58 = vrot.slane %v404_v26, 5 }
 0x12a   : > { %v265_v50 = vrot.slane %v2274_v4, 5  ;;  %v267_v6 = vrot.slane %v2274_v4, 6  ;;  %v433_v10 = vsel %vm325_vm4, %v432_v56, %v431_v1  ;;  %v436_v14 = vrot.slane %v406_v0, 4 }
 0x12b   : > { %v269_v27 = vrot.slane %v2274_v4, 7  ;;  %v291_v21 = vsel %vm236_vm0, %v259_v48, 0.0  ;;  %v435_v42 = vsel %vm328_vm5, %v434_v58, %v433_v10  ;;  %v438_v32 = vrot.slane %v408_v31, 3 }
 0x12c   : > { %v440_v3 = vrot.slane %v410_v34, 2  ;;  %v293_v12 = vsel %vm236_vm0, %v261_v29, 0.0  ;;  %v437_v8 = vsel %vm331_vm6, %v436_v14, %v435_v42  ;;  %v295_v41 = vsel %vm236_vm0, %v263_v59, 0.0  ;;  %v1199_v29 = vpop.permute.xlu0 %1198 }
 0x12d   : > { %v339_v24 = vrot.slane %v289_v51, 7  ;;  %v341_v15 = vrot.slane %v291_v21, 6  ;;  %v439_v30 = vsel %vm334_vm9, %v438_v32, %v437_v8  ;;  %v287_v48 = vsel %vm236_vm0, %v2274_v4, 0.0 }
 0x12e   : > { %v297_v28 = vsel %vm236_vm0, %v265_v50, 0.0  ;;  %v299_v19 = vsel %vm236_vm0, %v267_v6, 0.0  ;;  %v441_v36 = vsel %vm337_vm13, %v440_v3, %v439_v30  ;;  %v301_v13 = vsel %vm236_vm0, %v269_v27, 0.0 }
 0x12f   : > { %v340_v44 = vsel %vm319_vm2, %v339_v24, %v287_v48  ;;  %v343_v40 = vrot.slane %v293_v12, 5  ;;  %1234 = vmatpush1.msra.mxu0 %v441_v36  ;;  %v345_v33 = vrot.slane %v295_v41, 4  ;;  %v260_v4 = vrot.slane %v2282_v61, 3 }
 0x130   : > { %v342_v49 = vsel %vm322_vm3, %v341_v15, %v340_v44  ;;  %v262_v37 = vrot.slane %v2282_v61, 4  ;;  %v288_v9 = vsel %vm235_vm1, %v256_v47, 0.0  ;;  %v347_v2 = vrot.slane %v297_v28, 3 }
 0x131   : > { %v344_v16 = vsel %vm325_vm4, %v343_v40, %v342_v49  ;;  %v264_v57 = vrot.slane %v2282_v61, 5  ;;  %v349_v45 = vrot.slane %v299_v19, 2  ;;  %v266_v52 = vrot.slane %v2282_v61, 6 }
 0x132   : > { %v346_v55 = vsel %vm328_vm5, %v345_v33, %v344_v16  ;;  %v290_v38 = vsel %vm235_vm1, %v258_v43, 0.0  ;;  %v351_v63 = vrot.slane %v301_v13, 1  ;;  %v268_v47 = vrot.slane %v2282_v61, 7 }
 0x133   : > { %v348_v18 = vsel %vm331_vm6, %v347_v2, %v346_v55  ;;  %v292_v46 = vsel %vm235_vm1, %v260_v4, 0.0  ;;  %v294_v51 = vsel %vm235_vm1, %v262_v37, 0.0  ;;  %v318_v22 = vrot.slane %v288_v9, 7 }
 0x134   : > { %v350_v17 = vsel %vm334_vm9, %v349_v45, %v348_v18  ;;  %v321_v53 = vrot.slane %v290_v38, 6  ;;  %v286_v43 = vsel %vm235_vm1, %v2282_v61, 0.0  ;;  %v296_v11 = vsel %vm235_vm1, %v264_v57, 0.0 }
 0x135   : > { %v352_v62 = vsel %vm337_vm13, %v351_v63, %v350_v17  ;;  %v298_v54 = vsel %vm235_vm1, %v266_v52, 0.0  ;;  %v320_v39 = vsel %vm319_vm2, %v318_v22, %v286_v43  ;;  %v324_v25 = vrot.slane %v292_v46, 5 }
 0x136   : > { %1235 = vmatprep.subr.mxu0 %v352_v62  ;;  %v300_v35 = vsel %vm235_vm1, %v268_v47, 0.0  ;;  %v323_v26 = vsel %vm322_vm3, %v321_v53, %v320_v39  ;;  %v327_v20 = vrot.slane %v294_v51, 4  ;;  %v330_v7 = vrot.slane %v296_v11, 3 }
 0x137   : > { %v326_v23 = vsel %vm325_vm4, %v324_v25, %v323_v26  ;;  %v333_v0 = vrot.slane %v298_v54, 2  ;;  %v336_v34 = vrot.slane %v300_v35, 1  ;;  %vm1201_vm0 = vcmask 588800  }
 0x138   : > { %v329_v61 = vsel %vm328_vm5, %v327_v20, %v326_v23 }
 0x139   : > { %v332_v31 = vsel %vm331_vm6, %v330_v7, %v329_v61 }
 0x13a   : > { %v335_v60 = vsel %vm334_vm9, %v333_v0, %v332_v31 }
 0x13b   : > { %v338_v56 = vsel %vm337_vm13, %v336_v34, %v335_v60 }
 0x13c   : > { %1236 = vmatpush1.msra.mxu0 %v338_v56 }
 0x13d   : > { %1386 = vmatmul.mubr.msk.f32.vlgmr.msra.gmra.mxu0 %vm1201_vm0, %v229_v5 }
 0x1fd   : > { %v1271_v59 = vpop.f32.mrf.mxu0 }
 0x1fe   : > { %v1272_v1 = vadd.f32 %v1271_v59, %v1199_v29 }
 0x1ff   : > { %v1273_v58 = vpop.f32.mrf.mxu0 }
 0x200   : > { %1464 = vtanh.f32 %v1272_v1  ;;  %v1274_v50 = vadd.f32 %v1273_v58, %v1199_v29 }
 0x202   : > { %1466 = vtanh.f32 %v1274_v50 }
 0x20d   : > { %v1465_v6 = vpop.eup %1464 }
 0x20e   : > { %1278 = vst [vmem:[%s228_s5] sm:$0xff] %v1465_v6 }
 0x20f   : > { %v1467_v10 = vpop.eup %1466 }
 0x210   : > { %1279 = vst [vmem:[%s228_s5 + $0x8] sm:$0xff] %v1467_v10 }
 0x211   : > { %1535 = shalt.err (!%p1532_p0)
}
 0x212   : > { %s1536_s7 = scalar_lea.hbm %s2539_s21, 256  ;;  %s1540_s12 = scalar_lea.hbm %s2580_s4, 512 }
 0x213   : > { %p1537_p5 = scmp.ne.s32.totalorder %s2539_s21, %s1536_s7  ;;  %p1541_p1 = scmp.lt.s32.totalorder %s2539_s21, %s2580_s4 }
 0x214   : > { %p1542_p4 = scmp.lt.s32.totalorder %s1540_s12, %s1536_s7 }
 0x215   : > { %p1538_p9 = pnand %p1537_p5, %p2596_p3 }
 0x216   : > { %p1543_p6 = por %p1542_p4, %p1541_p1 }
 0x217   : > { %p1539_p12 = pneg %p1538_p9 }
 0x219   : > { %p1544_p8 = pnand %p1543_p6, %p1539_p12 }
 0x21b   : > { %1547 = shalt.err (!%p1544_p8)
}
 0x21c   : > { %1400 = dma.vmem_to_hbm [thread:$0]  (%p2596_p3), %s1296_s6, 256, %s2539_s21, %s1281_s26  }
 0x21d PF: > { %s1307_s14 = sand.u32 1, %s1578_s15   ;;  %p2597_p11 = scmp.ne.s32.totalorder %s2586_s22, 0 }
 0x21e   : > { %p2598_p7 = scmp.ge.s32.totalorder %s1590_s18, 2  ;;  %s1308_s20 = scalar_lea.sflag [#allocation5], %s1307_s14 }
 0x220   : > { %p1411_p10 = pnand %p2598_p7, %p2597_p11 }
 0x222   : > { %p1412_p2 = pneg %p1411_p10 }
 0x224   : > { %1573 = dma.done.wait (%p1412_p2), %s1308_s20, 256  }
 0x225   : > { %1575 = vsyncadd (%p1412_p2), %s1308_s20, 4294967040  ;;  %p18_p13 = scmp.ge.s32.totalorder %s1686_s27, 4   ;;  %s2599_s15 = smov %s1582_s16 }
 0x226   : > { %s2600_s16 = smov %s1586_s17  ;;  %s2601_s17 = smov %s1703_s9 }
 0x227   : > { %s2602_s18 = smov %s1686_s27  ;;  %20 = sbr.rel (!%p18_p13) target bundleno = 6 (0x6), region = 85 }
 0x22c   :  { %1313 = vsyncpa [#allocation4], 1 }
 0x22d   :  { %1315 = vsyncpa [#allocation4 + $0x1], 1 }
 0x22e   :  { %1316 = vsyncpa [#allocation7], 1 }
 0x22f   :  { %1317 = vsyncpa [#allocation5], 1 }
 0x230   :  { %1319 = vsyncpa [#allocation5 + $0x1], 1 }

</bundles_post_ra>
